<compile_context>
chip_gen: v7x
topology: tpu7x:2x2x1
jax: 0.10.0
libtpu: 0.0.40
codegen_flags: <defaults>
</compile_context>

<pallas_src>
import jax
import jax.numpy as jnp
from jax.experimental import pallas as pl
from jax.experimental.pallas import tpu as pltpu

EPS = 1e-5          # PyTorch BatchNorm default eps
NEG_SLOPE = 0.2     # LeakyReLU negative slope


def _leaky(x):
    return jnp.where(x > 0, x, NEG_SLOPE * x)


def _bn_frames(x, gamma, beta):
    # x: (Tb, R, C).  Train-mode BatchNorm2d: per-frame, per-channel stats over
    # all batch*spatial rows (axis=1), biased variance.  Kept in f32.
    mean = jnp.mean(x, axis=1, keepdims=True)
    var = jnp.mean(jnp.square(x - mean), axis=1, keepdims=True)
    return gamma * (x - mean) * jax.lax.rsqrt(var + EPS) + beta


# ---------------- Pallas kernels ----------------

def sent_kernel(cond_ref, wl_ref, bl_ref, gs_ref, bs_ref, wpb_ref, o_ref):
    # sent_map (Linear + BatchNorm1d + LeakyReLU) fused with the hoisted
    # predictor-conv1 contribution sent @ Wpb  ->  (B, C).  Runs exactly once.
    y = jnp.dot(cond_ref[...], wl_ref[...],
                preferred_element_type=jnp.float32) + bl_ref[...]
    mean = jnp.mean(y, axis=0, keepdims=True)
    var = jnp.mean(jnp.square(y - mean), axis=0, keepdims=True)
    s = _leaky(gs_ref[...] * (y - mean) * jax.lax.rsqrt(var + EPS) + bs_ref[...])
    o_ref[...] = jnp.dot(s, wpb_ref[...], preferred_element_type=jnp.float32)


def frame_kernel(x_ref, wfm_ref, g1_ref, b1_ref, srows_ref, wpa_ref,
                 g2_ref, b2_ref, w2_ref, o_ref):
    Tb, B = o_ref.shape
    HW, C = w2_ref.shape
    R = B * HW

    # frame_map: 1x1 conv (bf16 MXU matmul, f32 accumulation) + BN2d + LeakyReLU
    h = jnp.dot(x_ref[...], wfm_ref[...],
                preferred_element_type=jnp.float32)              # (Tb*R, C) f32
    h = _leaky(_bn_frames(h.reshape(Tb, R, C), g1_ref[...], b1_ref[...]))

    # predictor conv1 on concat([frame, sent_dupe]) == h @ Wpa + (hoisted,
    # row-replicated) sent @ Wpb, then BN2d + LeakyReLU.
    y = jnp.dot(h.reshape(Tb * R, C).astype(jnp.bfloat16), wpa_ref[...],
                preferred_element_type=jnp.float32)              # (Tb*R, C) f32
    y = y.reshape(Tb, R, C) + srows_ref[...]
    y = _leaky(_bn_frames(y, g2_ref[...], b2_ref[...]))          # (Tb, R, C)

    # predictor conv2: Conv2d(512, 1, 2, 2) with H=W=2 -> one scalar per
    # (frame, batch).  Rows are hw-major so each hw group is a contiguous
    # sublane slice: VPU multiply + channel (lane) reduce, no MXU involved.
    w2 = w2_ref[...]                                              # (HW, C)
    acc = y[:, 0:B, :] * w2[0:1, :]
    for hw in range(1, HW):                                       # HW == 4
        acc = acc + y[:, hw * B:(hw + 1) * B, :] * w2[hw:hw + 1, :]
    o_ref[...] = jnp.sum(acc, axis=2)                             # (Tb, B)


# ---------------- wrapper ----------------

def frame_discrim_forward(xbar, cond, p):
    T, B, C, H, W = xbar.shape
    CD = cond.shape[1]
    HW = H * W
    R = HW * B
    # TODO(synk): general H,W (multiple conv2 output positions) not supported;
    # the module's view(B,-1).squeeze(1) implies a single 1x1 conv2 output.
    assert (H // 2) * (W // 2) == 1

    # ---- sentence path: computed once, hoisted out of the frame loop ----
    wp_t = p["Wp"].T                                     # (C + CD, C)
    sent_contrib = pl.pallas_call(
        sent_kernel,
        out_shape=jax.ShapeDtypeStruct((B, C), jnp.float32),
    )(cond, p["Wl"].T, p["bl"].reshape(1, CD),
      p["gs"].reshape(1, CD), p["bs"].reshape(1, CD), wp_t[C:])
    # replicate onto every spatial position (rows are hw-major: row = hw*B + b)
    srows = jnp.tile(sent_contrib, (HW, 1))              # (R, C) f32

    # ---- channels-last, hw-major frame rows; bf16 for the MXU ----
    # TODO(synk): producing xbar channels-last upstream (or fusing this
    # transpose into the pallas_call feed) would avoid one HBM round-trip.
    x_rows = jnp.transpose(xbar, (0, 3, 4, 1, 2)).reshape(T, R, C)
    x_rows = x_rows.astype(jnp.bfloat16)

    # frames per grid step: fill the MXU M-dimension (~256 rows per matmul).
    Tb = max(1, 256 // R)
    if Tb >= T:
        Tb = T                                           # single grid step
    else:
        Tb = max(8, (Tb // 8) * 8)                       # keep blocks 8-aligned
    T_pad = -(-T // Tb) * Tb
    if T_pad != T:                                       # zero-pad frames; they
        x_rows = jnp.pad(x_rows, ((0, T_pad - T), (0, 0), (0, 0)))  # get sliced off
    x_flat = x_rows.reshape(T_pad * R, C)

    wfm_t = p["Wfm"].T.astype(jnp.bfloat16)              # (C, C)
    wpa_t = wp_t[:C].astype(jnp.bfloat16)                # (C, C)
    w2_hw = jnp.transpose(p["W2"][0], (1, 2, 0)).reshape(HW, C)  # (HW, C) f32

    out = pl.pallas_call(
        frame_kernel,
        out_shape=jax.ShapeDtypeStruct((T_pad, B), jnp.float32),
        grid=(T_pad // Tb,),
        in_specs=[
            pl.BlockSpec((Tb * R, C), lambda t: (t, 0)),   # frame rows (bf16)
            pl.BlockSpec((C, C), lambda t: (0, 0)),        # frame_map W^T (bf16)
            pl.BlockSpec((1, C), lambda t: (0, 0)),        # bn1 gamma
            pl.BlockSpec((1, C), lambda t: (0, 0)),        # bn1 beta
            pl.BlockSpec((R, C), lambda t: (0, 0)),        # hoisted sent rows
            pl.BlockSpec((C, C), lambda t: (0, 0)),        # pred conv1 Wa^T (bf16)
            pl.BlockSpec((1, C), lambda t: (0, 0)),        # bn2 gamma
            pl.BlockSpec((1, C), lambda t: (0, 0)),        # bn2 beta
            pl.BlockSpec((HW, C), lambda t: (0, 0)),       # conv2 weight (hw, c)
        ],
        out_specs=pl.BlockSpec((Tb, B), lambda t: (t, 0)),
        compiler_params=pltpu.CompilerParams(
            dimension_semantics=("parallel",)),            # split T across TCs
    )(x_flat, wfm_t,
      p["g1"].reshape(1, C), p["b1"].reshape(1, C),
      srows, wpa_t,
      p["g2"].reshape(1, C), p["b2"].reshape(1, C),
      w2_hw)

    # output.view(B, -1).squeeze(1):  (H//2)*(W//2) == 1 here -> (T, B)
    return out[:T]


# ---------------- deterministic parameters ----------------

def init_params(key, C=512, CD=128):
    ks = jax.random.split(key, 11)
    n = jax.random.normal
    return dict(
        Wfm=0.05 * n(ks[0], (C, C), jnp.float32),          # Conv2d(512,512,1)
        g1=1.0 + 0.1 * n(ks[1], (C,), jnp.float32),        # BN2d gamma
        b1=0.1 * n(ks[2], (C,), jnp.float32),               # BN2d beta
        Wp=0.05 * n(ks[3], (C, C + CD), jnp.float32),       # Conv2d(512+CD,512,1)
        g2=1.0 + 0.1 * n(ks[4], (C,), jnp.float32),
        b2=0.1 * n(ks[5], (C,), jnp.float32),
        W2=0.05 * n(ks[6], (1, C, 2, 2), jnp.float32),      # Conv2d(512,1,2,2)
        Wl=0.05 * n(ks[7], (CD, CD), jnp.float32),          # Linear(CD,CD)
        bl=0.1 * n(ks[8], (CD,), jnp.float32),
        gs=1.0 + 0.1 * n(ks[9], (CD,), jnp.float32),        # BN1d gamma
        bs=0.1 * n(ks[10], (CD,), jnp.float32),              # BN1d beta
    )


# ---------------- pure-JAX reference (mirrors the PyTorch forward) ----------------

def reference(xbar, cond, p):
    hp = jax.lax.Precision.HIGHEST
    B, CD = cond.shape
    y = jnp.dot(cond, p["Wl"].T, precision=hp) + p["bl"]
    mean = y.mean(0)
    var = ((y - mean) ** 2).mean(0)
    sent = _leaky(p["gs"] * (y - mean) / jnp.sqrt(var + EPS) + p["bs"])

    def bn2d(x, g, b):
        m = x.mean(axis=(0, 2, 3), keepdims=True)
        v = ((x - m) ** 2).mean(axis=(0, 2, 3), keepdims=True)
        return (g[None, :, None, None] * (x - m) / jnp.sqrt(v + EPS)
                + b[None, :, None, None])

    outs = []
    for t in range(xbar.shape[0]):
        f = xbar[t]                                           # (B, C, H, W)
        h = jnp.einsum("oi,bihw->bohw", p["Wfm"], f, precision=hp)
        h = _leaky(bn2d(h, p["g1"], p["b1"]))
        sd = jnp.broadcast_to(sent[:, :, None, None],
                              (B, CD, h.shape[2], h.shape[3]))
        fs = jnp.concatenate([h, sd], axis=1)
        y2 = jnp.einsum("oi,bihw->bohw", p["Wp"], fs, precision=hp)
        y2 = _leaky(bn2d(y2, p["g2"], p["b2"]))
        out = jnp.einsum("bchw,chw->b", y2, p["W2"][0], precision=hp)
        outs.append(out)
    return jnp.stack(outs, 0)


if __name__ == "__main__":
    T, B, C, H, W, CD = 3, 2, 512, 2, 2, 128   # small shapes; C=512 fixed by module
    key = jax.random.PRNGKey(0)
    kx, kc, kp = jax.random.split(key, 3)
    xbar = jax.random.normal(kx, (T, B, C, H, W), jnp.float32)
    cond = jax.random.normal(kc, (B, CD), jnp.float32)
    params = init_params(kp, C, CD)

    out = jax.block_until_ready(frame_discrim_forward(xbar, cond, params))

    ref = reference(xbar, cond, params)
    assert out.shape == (T, B), out.shape
    assert jnp.allclose(out, ref, atol=5e-2, rtol=5e-2), (out, ref)
    print("KERNEL_OK")
</pallas_src>

<mosaic_0001>
module attributes {stable_mosaic.version = 11 : i64} {
  func.func @sent_kernel(%arg0: memref<2x128xf32, #tpu.memory_space<vmem>>, %arg1: memref<128x128xf32, #tpu.memory_space<vmem>>, %arg2: memref<1x128xf32, #tpu.memory_space<vmem>>, %arg3: memref<1x128xf32, #tpu.memory_space<vmem>>, %arg4: memref<1x128xf32, #tpu.memory_space<vmem>>, %arg5: memref<128x512xf32, #tpu.memory_space<vmem>>, %arg6: memref<2x512xf32, #tpu.memory_space<vmem>>) attributes {dimension_semantics = [], scalar_prefetch = 0 : i64, scratch_operands = 0 : i64, tpu.core_type = #tpu.core_type<tc>} {
    %c0 = arith.constant 0 : index
    %c0_0 = arith.constant 0 : index
    %0 = vector.load %arg0[%c0, %c0_0] : memref<2x128xf32, #tpu.memory_space<vmem>>, vector<2x128xf32>
    %c0_1 = arith.constant 0 : index
    %c0_2 = arith.constant 0 : index
    %1 = vector.load %arg1[%c0_1, %c0_2] : memref<128x128xf32, #tpu.memory_space<vmem>>, vector<128x128xf32>
    %cst = arith.constant dense<0.000000e+00> : vector<2x128xf32>
    %2 = tpu.matmul %0, %1, %cst {dimension_numbers = #tpu.dot_dimension_numbers<[1], [0], [0], [1], [0, 0, 1, 1], [], []>} : vector<2x128xf32>, vector<128x128xf32>, vector<2x128xf32> -> vector<2x128xf32>
    %c0_3 = arith.constant 0 : index
    %c0_4 = arith.constant 0 : index
    %3 = vector.load %arg2[%c0_3, %c0_4] : memref<1x128xf32, #tpu.memory_space<vmem>>, vector<1x128xf32>
    %4 = vector.broadcast %3 : vector<1x128xf32> to vector<2x128xf32>
    %5 = arith.addf %2, %4 : vector<2x128xf32>
    %cst_5 = arith.constant dense<0.000000e+00> : vector<128xf32>
    %6 = vector.multi_reduction <add>, %5, %cst_5 [0] : vector<2x128xf32> to vector<128xf32>
    %7 = vector.shape_cast %6 : vector<128xf32> to vector<1x128xf32>
    %cst_6 = arith.constant 2.000000e+00 : f32
    %8 = vector.broadcast %cst_6 : f32 to vector<1x128xf32>
    %9 = arith.divf %7, %8 : vector<1x128xf32>
    %10 = vector.broadcast %9 : vector<1x128xf32> to vector<2x128xf32>
    %11 = arith.subf %5, %10 : vector<2x128xf32>
    %12 = arith.mulf %11, %11 : vector<2x128xf32>
    %cst_7 = arith.constant dense<0.000000e+00> : vector<128xf32>
    %13 = vector.multi_reduction <add>, %12, %cst_7 [0] : vector<2x128xf32> to vector<128xf32>
    %14 = vector.shape_cast %13 : vector<128xf32> to vector<1x128xf32>
    %cst_8 = arith.constant 2.000000e+00 : f32
    %15 = vector.broadcast %cst_8 : f32 to vector<1x128xf32>
    %16 = arith.divf %14, %15 : vector<1x128xf32>
    %c0_9 = arith.constant 0 : index
    %c0_10 = arith.constant 0 : index
    %17 = vector.load %arg3[%c0_9, %c0_10] : memref<1x128xf32, #tpu.memory_space<vmem>>, vector<1x128xf32>
    %18 = vector.broadcast %9 : vector<1x128xf32> to vector<2x128xf32>
    %19 = arith.subf %5, %18 : vector<2x128xf32>
    %20 = vector.broadcast %17 : vector<1x128xf32> to vector<2x128xf32>
    %21 = arith.mulf %20, %19 : vector<2x128xf32>
    %cst_11 = arith.constant 9.99999974E-6 : f32
    %22 = vector.broadcast %cst_11 : f32 to vector<1x128xf32>
    %23 = arith.addf %16, %22 : vector<1x128xf32>
    %24 = math.rsqrt %23 : vector<1x128xf32>
    %25 = vector.broadcast %24 : vector<1x128xf32> to vector<2x128xf32>
    %26 = arith.mulf %21, %25 : vector<2x128xf32>
    %c0_12 = arith.constant 0 : index
    %c0_13 = arith.constant 0 : index
    %27 = vector.load %arg4[%c0_12, %c0_13] : memref<1x128xf32, #tpu.memory_space<vmem>>, vector<1x128xf32>
    %28 = vector.broadcast %27 : vector<1x128xf32> to vector<2x128xf32>
    %29 = arith.addf %26, %28 : vector<2x128xf32>
    %cst_14 = arith.constant 0.000000e+00 : f32
    %30 = vector.broadcast %cst_14 : f32 to vector<2x128xf32>
    %31 = arith.cmpf ogt, %29, %30 : vector<2x128xf32>
    %cst_15 = arith.constant 2.000000e-01 : f32
    %32 = vector.broadcast %cst_15 : f32 to vector<2x128xf32>
    %33 = arith.mulf %32, %29 : vector<2x128xf32>
    %34 = arith.select %31, %29, %33 : vector<2x128xi1>, vector<2x128xf32>
    %c0_16 = arith.constant 0 : index
    %c0_17 = arith.constant 0 : index
    %35 = vector.load %arg5[%c0_16, %c0_17] : memref<128x512xf32, #tpu.memory_space<vmem>>, vector<128x512xf32>
    %cst_18 = arith.constant dense<0.000000e+00> : vector<2x512xf32>
    %36 = tpu.matmul %34, %35, %cst_18 {dimension_numbers = #tpu.dot_dimension_numbers<[1], [0], [0], [1], [0, 0, 1, 1], [], []>} : vector<2x128xf32>, vector<128x512xf32>, vector<2x512xf32> -> vector<2x512xf32>
    %c0_19 = arith.constant 0 : index
    %c0_20 = arith.constant 0 : index
    %37 = vector.load %arg6[%c0_19, %c0_20] : memref<2x512xf32, #tpu.memory_space<vmem>>, vector<2x512xf32>
    tpu.vector_store %arg6[%c0_19, %c0_20], %36 {strides = array<i32>} : memref<2x512xf32, #tpu.memory_space<vmem>>, vector<2x512xf32>,
    return
  }
}

</mosaic_0001>

<bundles_post_ra>
// kernel: tpu_custom_call.1
= control target key start
LH: loop header
LB: loop body
LE: loop exit
PB: predicated region body
PF: predicated region fallthrough
CT: control target
= control target key end

     0   :  { %11 = vsyncpa [#allocation3], 0  ;;  %s799_s0 = inlined_call_operand.hbm [shape: f32[2,128], index: 0, kind: input, shape index: {}]   ;;  %s800_s1 = inlined_call_operand.hbm [shape: f32[128,128], index: 1, kind: input, shape index: {}]   ;;  %s801_s2 = inlined_call_operand.vmem [shape: f32[1,128], index: 2, kind: input, shape index: {}]   ;;  %s802_s3 = inlined_call_operand.vmem [shape: f32[1,128], index: 3, kind: input, shape index: {}]   ;;  %s803_s4 = inlined_call_operand.vmem [shape: f32[1,128], index: 4, kind: input, shape index: {}]   ;;  %s804_s5 = inlined_call_operand.hbm [shape: f32[128,512], index: 5, kind: input, shape index: {}]   ;;  %s805_s6 = inlined_call_operand.hbm [shape: f32[2,512], index: 6, kind: output, shape index: {}]  }
   0x1   :  { %12 = vsyncpa [#allocation6], 0 }
   0x2   :  { %13 = vsyncpa [#allocation4], 0  ;;  %s695_s21 = smov [#allocation5]   ;;  %s601_s25 = scalar_lea.hbm %s800_s1, 2048 }
   0x3   :  { %s29_s22 = sshll.u32 %s695_s21, 4  ;;  %p602_p0 = scmp.ne.s32.totalorder %s800_s1, %s601_s25  ;;  %s30_s22 = int_to_ptr.vmem [resolvable:$true] %s29_s22 }
   0x4   :  { %p605_p1 = scmp.lt.u32.totalorder %s601_s25, %s800_s1 }
   0x6   :  { %p607_p2 = pnand %p605_p1, %p602_p0 }
   0x8   :  { %610 = shalt.err (!%p607_p2)
}
   0x9   :  { %s611_s30 = scalar_lea.vmem %s30_s22, 2048  ;;  %p616_p4 = scmp.lt.s32.totalorder %s30_s22, %s30_s22 }
   0xa   :  { %p612_p3 = scmp.ne.s32.totalorder %s30_s22, %s611_s30  ;;  %p617_p5 = scmp.lt.s32.totalorder %s611_s30, %s611_s30 }
   0xc   :  { %p618_p6 = por %p617_p5, %p616_p4 }
   0xe   :  { %p619_p7 = pnand %p618_p6, %p612_p3 }
  0x10   :  { %622 = shalt.err (!%p619_p7)
}
  0x11   :  { %s696_s7 = smov 128   ;;  %s697_s8 = smov 8  }
  0x12   :  { %35 = dma.hbm_to_vmem [thread:$0]  %s800_s1, 2048, %s30_s22, [#allocation6], %s696_s7, %s696_s7, %s697_s8  }
  0x13   :  { %s698_s11 = smov [#allocation2]   ;;  %s699_s13 = smov [#allocation7]  }
  0x14   :  { %s20_s12 = sshll.u32 %s698_s11, 4  ;;  %s47_s14 = sshll.u32 %s699_s13, 4  ;;  %s21_s12 = int_to_ptr.vmem [resolvable:$true] %s20_s12  ;;  %s48_s14 = int_to_ptr.vmem [resolvable:$true] %s47_s14 }
  0x15   :  { %s623_s17 = scalar_lea.hbm %s799_s0, 32 }
  0x16   :  { %p624_p8 = scmp.ne.s32.totalorder %s799_s0, %s623_s17  ;;  %p627_p9 = scmp.lt.u32.totalorder %s623_s17, %s799_s0 }
  0x18   :  { %p629_p10 = pnand %p627_p9, %p624_p8 }
  0x1a   :  { %632 = shalt.err (!%p629_p10)
}
  0x1b   :  { %s633_s1 = scalar_lea.vmem %s21_s12, 32  ;;  %p638_p12 = scmp.lt.s32.totalorder %s21_s12, %s21_s12 }
  0x1c   :  { %p634_p11 = scmp.ne.s32.totalorder %s21_s12, %s633_s1  ;;  %p639_p13 = scmp.lt.s32.totalorder %s633_s1, %s633_s1 }
  0x1e   :  { %p640_p0 = por %p639_p13, %p638_p12 }
  0x20   :  { %p641_p1 = pnand %p640_p0, %p634_p11 }
  0x22   :  { %644 = shalt.err (!%p641_p1)
}
  0x23   :  { %23 = dma.hbm_to_vmem [thread:$0]  %s799_s0, 32, %s21_s12, [#allocation3]  }
  0x24   :  { %s645_s26 = scalar_lea.hbm %s804_s5, 8192 }
  0x25   :  { %p646_p2 = scmp.ne.s32.totalorder %s804_s5, %s645_s26  ;;  %p649_p3 = scmp.lt.u32.totalorder %s645_s26, %s804_s5 }
  0x27   :  { %p651_p4 = pnand %p649_p3, %p646_p2 }
  0x29   :  { %654 = shalt.err (!%p651_p4)
}
  0x2a   :  { %s655_s7 = scalar_lea.vmem %s48_s14, 8192  ;;  %p660_p6 = scmp.lt.s32.totalorder %s48_s14, %s48_s14 }
  0x2b   :  { %p656_p5 = scmp.ne.s32.totalorder %s48_s14, %s655_s7  ;;  %p661_p7 = scmp.lt.s32.totalorder %s655_s7, %s655_s7 }
  0x2d   :  { %p662_p8 = por %p661_p7, %p660_p6 }
  0x2f   :  { %p663_p9 = pnand %p662_p8, %p656_p5 }
  0x31   :  { %666 = shalt.err (!%p663_p9)
}
  0x32   :  { %s700_s0 = smov 512   ;;  %s701_s8 = smov 32  }
  0x33   :  { %53 = dma.hbm_to_vmem [thread:$0]  %s804_s5, 8192, %s48_s14, [#allocation6], %s700_s0, %s700_s0, %s701_s8  }
  0x34   :  { %689 = dma.done.wait [#allocation3], 32  }
  0x35   :  { %690 = vsyncadd [#allocation3], 4294967264 }
  0x36   :  { %691 = dma.done.wait [#allocation6], 10240  }
  0x37   :  { %692 = vsyncadd [#allocation6], 4294957056  ;;  %v702_v0 = vmov 0.0|0.0   ;;  %vm703_vm0 = vmmov 0   ;;  %v704_v1 = vmov 0.0   ;;  %v64_v2 = vld [vmem:[#allocation5] sm:$0xff] }
  0x38   :  { %499 = vmatprep.subr.bf16.mxu0 %v702_v0  ;;  %496 = vmatprep.mubr.msk.f32.mxu0 %vm703_vm0, %v704_v1  ;;  %v65_v3 = vld [vmem:[#allocation5 + $0x8] sm:$0xff]  ;;  %v66_v4 = vld [vmem:[#allocation5 + $0x10] sm:$0xff]  ;;  %v67_v6 = vld [vmem:[#allocation5 + $0x18] sm:$0xff]  ;;  %vm157_vm1 = vcmask 1041408  }
  0x39   :  { %327 = vmatprep.mubr.f32.mxu1 %v704_v1  ;;  %v500_v5 = vpack.c.bf16 %v65_v3, %v64_v2  ;;  %v503_v7 = vpack.c.bf16 %v67_v6, %v66_v4  ;;  %v68_v8 = vld [vmem:[#allocation5 + $0x20] sm:$0xff]  ;;  %v69_v9 = vld [vmem:[#allocation5 + $0x28] sm:$0xff]  ;;  %v70_v11 = vld [vmem:[#allocation5 + $0x30] sm:$0xff] }
  0x3a   :  { %v506_v10 = vpack.c.bf16 %v69_v9, %v68_v8  ;;  %v71_v12 = vld [vmem:[#allocation5 + $0x38] sm:$0xff]  ;;  %v72_v14 = vld [vmem:[#allocation5 + $0x40] sm:$0xff]  ;;  %v73_v15 = vld [vmem:[#allocation5 + $0x48] sm:$0xff] }
  0x3b   :  { %501 = vmatpush3.bf16.msra.mxu0 %v500_v5  ;;  %v509_v13 = vpack.c.bf16 %v71_v12, %v70_v11  ;;  %v512_v16 = vpack.c.bf16 %v73_v15, %v72_v14  ;;  %v74_v17 = vld [vmem:[#allocation5 + $0x50] sm:$0xff]  ;;  %v75_v18 = vld [vmem:[#allocation5 + $0x58] sm:$0xff]  ;;  %v76_v20 = vld [vmem:[#allocation5 + $0x60] sm:$0xff] }
  0x3c   :  { %502 = vmatprep.subr.bf16.mxu0 %v702_v0  ;;  %v515_v19 = vpack.c.bf16 %v75_v18, %v74_v17  ;;  %v77_v21 = vld [vmem:[#allocation5 + $0x68] sm:$0xff]  ;;  %v78_v23 = vld [vmem:[#allocation5 + $0x70] sm:$0xff]  ;;  %v79_v24 = vld [vmem:[#allocation5 + $0x78] sm:$0xff] }
  0x3d   :  { %v518_v22 = vpack.c.bf16 %v77_v21, %v76_v20  ;;  %v521_v25 = vpack.c.bf16 %v79_v24, %v78_v23  ;;  %v63_v26 = vld [vmem:[#allocation2] sm:$0x3]  ;;  %v200_v27 = vld [vmem:[#allocation7 + $0x8] sm:$0xff]  ;;  %v199_v32 = vld [vmem:[#allocation7] sm:$0xff] }
  0x3e   :  { %v204_v28 = vld [vmem:[#allocation7 + $0x28] sm:$0xff]  ;;  %v202_v29 = vld [vmem:[#allocation7 + $0x18] sm:$0xff]  ;;  %v203_v33 = vld [vmem:[#allocation7 + $0x20] sm:$0xff] }
  0x3f   :  { %504 = vmatpush3.bf16.msra.mxu0 %v503_v7  ;;  %v523_v30 = vpack.c.bf16 %v204_v28, %v200_v27  ;;  %v206_v31 = vld [vmem:[#allocation7 + $0x38] sm:$0xff]  ;;  %v525_v35 = vpack.c.bf16 %v203_v33, %v199_v32  ;;  %v201_v36 = vld [vmem:[#allocation7 + $0x10] sm:$0xff]  ;;  %v208_v39 = vld [vmem:[#allocation7 + $0x48] sm:$0xff] }
  0x40   :  { %505 = vmatprep.subr.bf16.mxu0 %v702_v0  ;;  %v555_v34 = vpack.c.bf16 %v206_v31, %v202_v29  ;;  %v205_v37 = vld [vmem:[#allocation7 + $0x30] sm:$0xff]  ;;  %v212_v40 = vld [vmem:[#allocation7 + $0x68] sm:$0xff]  ;;  %v210_v41 = vld [vmem:[#allocation7 + $0x58] sm:$0xff] }
  0x41   :  { %524 = vmatprep.subr.bf16.mxu1 %v523_v30  ;;  %v557_v38 = vpack.c.bf16 %v205_v37, %v201_v36  ;;  %v527_v42 = vpack.c.bf16 %v212_v40, %v208_v39  ;;  %v214_v43 = vld [vmem:[#allocation7 + $0x78] sm:$0xff]  ;;  %v207_v44 = vld [vmem:[#allocation7 + $0x40] sm:$0xff]  ;;  %v209_v48 = vld [vmem:[#allocation7 + $0x50] sm:$0xff] }
  0x42   :  { %526 = vmatpush1.bf16.msra.mxu1 %v525_v35  ;;  %v211_v45 = vld [vmem:[#allocation7 + $0x60] sm:$0xff]  ;;  %v559_v46 = vpack.c.bf16 %v214_v43, %v210_v41  ;;  %v213_v49 = vld [vmem:[#allocation7 + $0x70] sm:$0xff]  ;;  %v216_v51 = vld [vmem:[#allocation7 + $0x88] sm:$0xff] }
  0x43   :  { %507 = vmatpush3.bf16.msra.mxu0 %v506_v10  ;;  %v529_v47 = vpack.c.bf16 %v211_v45, %v207_v44  ;;  %528 = vmatprep.subr.bf16.mxu1 %v527_v42  ;;  %v561_v50 = vpack.c.bf16 %v213_v49, %v209_v48  ;;  %v220_v52 = vld [vmem:[#allocation7 + $0xa8] sm:$0xff]  ;;  %v218_v53 = vld [vmem:[#allocation7 + $0x98] sm:$0xff]  ;;  %v215_v56 = vld [vmem:[#allocation7 + $0x80] sm:$0xff] }
  0x44   :  { %508 = vmatprep.subr.bf16.mxu0 %v702_v0  ;;  %v531_v54 = vpack.c.bf16 %v220_v52, %v216_v51  ;;  %v222_v55 = vld [vmem:[#allocation7 + $0xb8] sm:$0xff]  ;;  %v219_v57 = vld [vmem:[#allocation7 + $0xa0] sm:$0xff]  ;;  %v217_v60 = vld [vmem:[#allocation7 + $0x90] sm:$0xff] }
  0x45   :  { %v563_v58 = vpack.c.bf16 %v222_v55, %v218_v53  ;;  %v533_v59 = vpack.c.bf16 %v219_v57, %v215_v56  ;;  %v221_v61 = vld [vmem:[#allocation7 + $0xb0] sm:$0xff]  ;;  %v224_v63 = vld [vmem:[#allocation7 + $0xc8] sm:$0xff]  ;;  %v230_v3 = vld [vmem:[#allocation7 + $0xf8] sm:$0xff] }
  0x46   :  { %530 = vmatpush1.bf16.msra.mxu1 %v529_v47  ;;  %v565_v62 = vpack.c.bf16 %v221_v61, %v217_v60  ;;  %v223_v4 = vld [vmem:[#allocation7 + $0xc0] sm:$0xff]  ;;  %v225_v8 = vld [vmem:[#allocation7 + $0xd0] sm:$0xff]  ;;  %v232_v11 = vld [vmem:[#allocation7 + $0x108] sm:$0xff] }
  0x47   :  { %510 = vmatpush3.bf16.msra.mxu0 %v509_v13  ;;  %532 = vmatprep.subr.bf16.mxu1 %v531_v54  ;;  %v227_v5 = vld [vmem:[#allocation7 + $0xe0] sm:$0xff]  ;;  %v229_v9 = vld [vmem:[#allocation7 + $0xf0] sm:$0xff]  ;;  %v236_v12 = vld [vmem:[#allocation7 + $0x128] sm:$0xff] }
  0x48   :  { %511 = vmatprep.subr.bf16.mxu0 %v702_v0  ;;  %v537_v7 = vpack.c.bf16 %v227_v5, %v223_v4  ;;  %v569_v10 = vpack.c.bf16 %v229_v9, %v225_v8  ;;  %v234_v13 = vld [vmem:[#allocation7 + $0x118] sm:$0xff]  ;;  %v539_v14 = vpack.c.bf16 %v236_v12, %v232_v11  ;;  %v235_v17 = vld [vmem:[#allocation7 + $0x120] sm:$0xff]  ;;  %v233_v20 = vld [vmem:[#allocation7 + $0x110] sm:$0xff] }
  0x49   :  { %v238_v15 = vld [vmem:[#allocation7 + $0x138] sm:$0xff]  ;;  %v237_v21 = vld [vmem:[#allocation7 + $0x130] sm:$0xff]  ;;  %v240_v23 = vld [vmem:[#allocation7 + $0x148] sm:$0xff] }
  0x4a   :  { %534 = vmatpush1.bf16.msra.mxu1 %v533_v59  ;;  %v571_v18 = vpack.c.bf16 %v238_v15, %v234_v13  ;;  %v244_v24 = vld [vmem:[#allocation7 + $0x168] sm:$0xff]  ;;  %v246_v27 = vld [vmem:[#allocation7 + $0x178] sm:$0xff]  ;;  %v239_v28 = vld [vmem:[#allocation7 + $0x140] sm:$0xff] }
  0x4b   :  { %513 = vmatpush3.bf16.msra.mxu0 %v512_v16  ;;  %v231_v16 = vld [vmem:[#allocation7 + $0x100] sm:$0xff]  ;;  %v241_v32 = vld [vmem:[#allocation7 + $0x150] sm:$0xff]  ;;  %v248_v35 = vld [vmem:[#allocation7 + $0x188] sm:$0xff] }
  0x4c   :  { %514 = vmatprep.subr.bf16.mxu0 %v702_v0  ;;  %v243_v29 = vld [vmem:[#allocation7 + $0x160] sm:$0xff]  ;;  %v245_v33 = vld [vmem:[#allocation7 + $0x170] sm:$0xff]  ;;  %v252_v36 = vld [vmem:[#allocation7 + $0x1a8] sm:$0xff] }
  0x4d   :  { %v545_v31 = vpack.c.bf16 %v243_v29, %v239_v28  ;;  %v250_v37 = vld [vmem:[#allocation7 + $0x198] sm:$0xff]  ;;  %v247_v40 = vld [vmem:[#allocation7 + $0x180] sm:$0xff]  ;;  %v249_v44 = vld [vmem:[#allocation7 + $0x190] sm:$0xff]  ;;  %v414_v28 = vlaneseq }
  0x4e   :  { %v254_v39 = vld [vmem:[#allocation7 + $0x1b8] sm:$0xff]  ;;  %v251_v41 = vld [vmem:[#allocation7 + $0x1a0] sm:$0xff]  ;;  %v253_v45 = vld [vmem:[#allocation7 + $0x1b0] sm:$0xff] }
  0x4f   :  { %516 = vmatpush3.bf16.msra.mxu0 %v515_v19  ;;  %v541_v19 = vpack.c.bf16 %v235_v17, %v231_v16  ;;  %v579_v42 = vpack.c.bf16 %v254_v39, %v250_v37  ;;  %v549_v43 = vpack.c.bf16 %v251_v41, %v247_v40  ;;  %v256_v47 = vld [vmem:[#allocation7 + $0x1c8] sm:$0xff]  ;;  %v258_v49 = vld [vmem:[#allocation7 + $0x1d8] sm:$0xff]  ;;  %v255_v52 = vld [vmem:[#allocation7 + $0x1c0] sm:$0xff] }
  0x50   :  { %517 = vmatprep.subr.bf16.mxu0 %v702_v0  ;;  %v260_v48 = vld [vmem:[#allocation7 + $0x1e8] sm:$0xff]  ;;  %v262_v51 = vld [vmem:[#allocation7 + $0x1f8] sm:$0xff]  ;;  %v259_v53 = vld [vmem:[#allocation7 + $0x1e0] sm:$0xff] }
  0x51   :  { %v583_v54 = vpack.c.bf16 %v262_v51, %v258_v49  ;;  %v553_v55 = vpack.c.bf16 %v259_v53, %v255_v52  ;;  %v257_v56 = vld [vmem:[#allocation7 + $0x1d0] sm:$0xff]  ;;  %v444_v59 = vld [vmem:[%s801_s2] ss:$0 sm:$0xff] }
  0x52   :  { %v261_v57 = vld [vmem:[#allocation7 + $0x1f0] sm:$0xff] }
  0x53   :  { %519 = vmatpush3.bf16.msra.mxu0 %v518_v22  ;;  %v573_v22 = vpack.c.bf16 %v237_v21, %v233_v20  ;;  %v446_v21 = vld [vmem:[%s803_s4] ss:$0 sm:$0xff] }
  0x54   :  { %520 = vmatprep.subr.bf16.mxu0 %v702_v0  ;;  %v228_v0 = vld [vmem:[#allocation7 + $0xe8] sm:$0xff] }
  0x55   :  { %v535_v2 = vpack.c.bf16 %v228_v0, %v224_v63 }
  0x57   :  { %522 = vmatpush3.bf16.msra.mxu0 %v521_v25  ;;  %536 = vmatprep.subr.bf16.mxu1 %v535_v2  ;;  %v242_v25 = vld [vmem:[#allocation7 + $0x158] sm:$0xff] }
  0x58   :  { %556 = vmatprep.subr.bf16.mxu0 %v555_v34  ;;  %538 = vmatpush1.bf16.msra.mxu1 %v537_v7  ;;  %v575_v30 = vpack.c.bf16 %v246_v27, %v242_v25  ;;  %v577_v34 = vpack.c.bf16 %v245_v33, %v241_v32 }
  0x59   :  { %540 = vmatprep.subr.bf16.mxu1 %v539_v14 }
  0x5a   :  { %497 = vmatmul.mubr.f32.vlgmr.msra.gmra.mrb[0].mxu0 %v63_v26  ;;  %v543_v26 = vpack.c.bf16 %v244_v24, %v240_v23 }
  0x5b   :  { %398 = vmatprep.mubr.f32.mxu0 %v704_v1  ;;  %558 = vmatpush1.bf16.msra.mxu0 %v557_v38  ;;  %v226_v1 = vld [vmem:[#allocation7 + $0xd8] sm:$0xff]  ;;  %v547_v38 = vpack.c.bf16 %v252_v36, %v248_v35 }
  0x5c   :  { %560 = vmatprep.subr.bf16.mxu0 %v559_v46  ;;  %v567_v6 = vpack.c.bf16 %v230_v3, %v226_v1  ;;  %542 = vmatpush1.bf16.msra.mxu1 %v541_v19  ;;  %v581_v46 = vpack.c.bf16 %v253_v45, %v249_v44 }
  0x5d   :  { %544 = vmatprep.subr.bf16.mxu1 %v543_v26  ;;  %v705_v26 = vmov 1983009808  }
  0x5e   :  { %v412_v27 = vunpack.c.l.s4 %v705_v26 }
  0x5f   :  { %562 = vmatpush1.bf16.msra.mxu0 %v561_v50  ;;  %v551_v50 = vpack.c.bf16 %v260_v48, %v256_v47 }
  0x60   :  { %564 = vmatprep.subr.bf16.mxu0 %v563_v58  ;;  %546 = vmatpush1.bf16.msra.mxu1 %v545_v31  ;;  %v585_v58 = vpack.c.bf16 %v261_v57, %v257_v56  ;;  %v413_v29 = vunpack.c.0.s8 %v412_v27 }
  0x61   :  { %548 = vmatprep.subr.bf16.mxu1 %v547_v38 }
  0x63   :  { %566 = vmatpush1.bf16.msra.mxu0 %v565_v62 }
  0x64   :  { %568 = vmatprep.subr.bf16.mxu0 %v567_v6  ;;  %550 = vmatpush1.bf16.msra.mxu1 %v549_v43 }
  0x65   :  { %552 = vmatprep.subr.bf16.mxu1 %v551_v50 }
  0x67   :  { %570 = vmatpush1.bf16.msra.mxu0 %v569_v10 }
  0x68   :  { %572 = vmatprep.subr.bf16.mxu0 %v571_v18  ;;  %554 = vmatpush1.bf16.msra.mxu1 %v553_v55  ;;  %v445_v18 = vld [vmem:[%s802_s3] ss:$0 sm:$0xff]  ;;  %s706_s3 = smov [#allocation8]  }
  0x69   :  { %s434_s4 = sshll.u32 %s706_s3, 4  ;;  %s435_s4 = int_to_ptr.vmem [resolvable:$true] %s434_s4 }
  0x6a   :  { %s667_s15 = scalar_lea.vmem %s435_s4, 128  ;;  %p672_p11 = scmp.lt.s32.totalorder %s435_s4, %s435_s4 }
  0x6b   :  { %574 = vmatpush1.bf16.msra.mxu0 %v573_v22  ;;  %p668_p10 = scmp.ne.s32.totalorder %s435_s4, %s667_s15  ;;  %p673_p12 = scmp.lt.s32.totalorder %s667_s15, %s667_s15 }
  0x6c   :  { %576 = vmatprep.subr.bf16.mxu0 %v575_v30  ;;  %v415_v30 = vshrl.u32 %v414_v28, 7 }
  0x6d   :  { %p674_p13 = por %p673_p12, %p672_p11 }
  0x6e   :  { %v416_v33 = vsub.s32 %v413_v29, %v415_v30 }
  0x6f   :  { %578 = vmatpush1.bf16.msra.mxu0 %v577_v34  ;;  %p675_p0 = pnand %p674_p13, %p668_p10 }
  0x70   :  { %580 = vmatprep.subr.bf16.mxu0 %v579_v42 }
  0x73   :  { %582 = vmatpush1.bf16.msra.mxu0 %v581_v46 }
  0x74   :  { %584 = vmatprep.subr.bf16.mxu0 %v583_v54 }
  0x77   :  { %586 = vmatpush1.bf16.msra.mxu0 %v585_v58 }
 0x12d   :  { %v153_v60 = vpop.f32.mrb[0].mxu0 }
 0x12e   :  { %v154_v61 = vadd.f32 %v444_v59, %v153_v60  ;;  %v498_v62 = vpop.f32.mrb[1].mxu0 }
 0x130   :  { %v158_v63 = vsel %vm157_vm1, %v154_v61, 0.0 }
 0x131   :  { %v159_v0 = vrot.slane %v158_v63, 4 }
 0x133   :  { %v160_v1 = vadd.f32 %v159_v0, %v158_v63 }
 0x135   :  { %v161_v2 = vrot.slane %v160_v1, 2 }
 0x137   :  { %v162_v3 = vadd.f32 %v161_v2, %v160_v1 }
 0x139   :  { %v163_v4 = vrot.slane %v162_v3, 1 }
 0x13b   :  { %v164_v5 = vadd.f32 %v163_v4, %v162_v3 }
 0x13d   :  { %v166_v6 = vmul.f32 0.5, %v164_v5 }
 0x13f   :  { %v167_v7 = vsub.f32 %v154_v61, %v166_v6 }
 0x141   :  { %v168_v8 = vmul.f32 %v167_v7, %v167_v7  ;;  %v184_v19 = vmul.f32 %v445_v18, %v167_v7 }
 0x143   :  { %v169_v9 = vsel %vm157_vm1, %v168_v8, 0.0 }
 0x144   :  { %v170_v10 = vrot.slane %v169_v9, 4 }
 0x146   :  { %v171_v11 = vadd.f32 %v170_v10, %v169_v9 }
 0x148   :  { %v172_v12 = vrot.slane %v171_v11, 2 }
 0x14a   :  { %v173_v13 = vadd.f32 %v172_v12, %v171_v11 }
 0x14c   :  { %v174_v14 = vrot.slane %v173_v13, 1 }
 0x14e   :  { %v175_v15 = vadd.f32 %v174_v14, %v173_v13 }
 0x150   :  { %v176_v16 = vmul.f32 0.5, %v175_v15 }
 0x152   :  { %v185_v17 = vadd.f32 1e-05, %v176_v16 }
 0x154   :  { %599 = vrsqrt.f32 %v185_v17 }
 0x15e   :  { %v600_v20 = vpop.eup %599 }
 0x15f   :  { %v187_v22 = vmul.f32 %v600_v20, %v184_v19 }
 0x161   :  { %v195_v23 = vadd.f32 %v446_v21, %v187_v22 }
 0x163   :  { %vm196_vm2 = vcmp.gt.f32.partialorder %v195_v23, 0.0  ;;  %v197_v24 = vmul.f32 0.2, %v195_v23 }
 0x165   :  { %v198_v25 = vsel %vm196_vm2, %v195_v23, %v197_v24 }
 0x166   :  { %328 = vmatmul.mubr.f32.vlgmr.msra.gmra.mrb[0].mxu1 %v198_v25  ;;  %399 = vmatmul.mubr.f32.vlgmr.msra.gmra.mrb[2].mxu0 %v198_v25 }
 0x239   :  { %v329_v31 = vpop.f32.mrb[0].mxu1  ;;  %v400_v32 = vpop.f32.mrb[2].mxu0 }
 0x23a   :  { %v331_v34 = vpop.f32.mrb[1].mxu1  ;;  %v402_v35 = vpop.f32.mrb[3].mxu0 }
 0x23b   :  { %v409_v36 = vcombine.low %v329_v31, %v331_v34  ;;  %v410_v37 = vcombine.low %v400_v32, %v402_v35 }
 0x23d   :  { %v417_v38 = vrot.slane %v409_v36, %v416_v33  ;;  %v424_v39 = vrot.slane %v410_v37, %v416_v33 }
 0x23f   :  { %v425_v40 = vcombine.low %v417_v38, %v424_v39 }
 0x241   :  { %427 = vst [vmem:[#allocation8] sm:$0xff] %v425_v40 }
 0x242   :  { %678 = shalt.err (!%p675_p0)
}
 0x243   :  { %s679_s18 = scalar_lea.hbm %s805_s6, 128 }
 0x244   :  { %p680_p1 = scmp.ne.s32.totalorder %s805_s6, %s679_s18  ;;  %p683_p2 = scmp.lt.u32.totalorder %s679_s18, %s805_s6 }
 0x246   :  { %p685_p3 = pnand %p683_p2, %p680_p1 }
 0x248   :  { %688 = shalt.err (!%p685_p3)
}
 0x249   :  { %437 = dma.vmem_to_hbm [thread:$0]  %s435_s4, 128, %s805_s6, [#allocation4]  }
 0x24a   :  { %693 = dma.done.wait [#allocation4], 128  }
 0x24b   :  { %694 = vsyncadd [#allocation4], 4294967168 }
 0x24c   :  { %441 = vsyncpa [#allocation3], 1 }
 0x24d   :  { %442 = vsyncpa [#allocation6], 1 }
 0x24e   :  { %443 = vsyncpa [#allocation4], 1 }

</bundles_post_ra>
